<compile_context>
chip_gen: v7x
topology: tpu7x:2x2x1
jax: 0.10.0
libtpu: 0.0.40
codegen_flags: <defaults>
</compile_context>

<pallas_src>
import functools

import jax
import jax.numpy as jnp
from jax.experimental import pallas as pl
from jax.experimental.pallas import tpu as pltpu


def _round_up(x, m):
    return (x + m - 1) // m * m


def _vmem_budget_bytes():
    """Physical VMEM budget with headroom (portable across 64/128 MiB parts)."""
    try:
        cap = int(pltpu.get_tpu_info().vmem_capacity_bytes)
    except Exception:
        cap = 64 << 20
    return min(int(cap * 0.85), 100 << 20)


def _tm_target():
    """Row-tile target from the W-stream roofline of the current generation."""
    try:
        kind = jax.devices()[0].device_kind.lower()
    except Exception:
        kind = ""
    if ("v5 lite" in kind) or ("v5e" in kind) or ("v5lite" in kind):
        return 256       # 197 TF/s / 0.82 TB/s  ~ 240 flops per W byte
    return 512           # v6e / v7x (256-wide MXU -> keep tm a multiple of 256)


def _logits_lse_kernel(x_ref, w_ref, b_ref, logits_ref, lse_ref, m_ref, s_ref):
    # x_ref      : (tm, d_model_p)  bf16 VMEM (row tile i, constant across vocab sweep)
    # w_ref      : (d_model_p, tn)  bf16 VMEM (vocab tile j)
    # b_ref      : (1, tn)          f32  VMEM (vocab tile j)
    # logits_ref : (tm, tn)         streamed output tile (i, j)
    # lse_ref    : (tm, 1)          f32, resident across the vocab sweep (row tile i)
    # m_ref/s_ref: (tm, 1)          f32 scratch (running max / running sum)
    j = pl.program_id(1)

    @pl.when(j == 0)
    def _init():
        m_ref[...] = jnp.full_like(m_ref, -jnp.inf)
        s_ref[...] = jnp.zeros_like(s_ref)

    logits = (
        jnp.dot(x_ref[...], w_ref[...], preferred_element_type=jnp.float32)
        + b_ref[...]
    )

    # Online log-sum-exp statistics (f32).
    m_prev = m_ref[...]
    m_new = jnp.maximum(m_prev, jnp.max(logits, axis=-1, keepdims=True))
    alpha = jnp.exp(m_prev - m_new)
    s_ref[...] = alpha * s_ref[...] + jnp.sum(
        jnp.exp(logits - m_new), axis=-1, keepdims=True)
    m_ref[...] = m_new

    # Stream this vocab tile's raw logits straight out (single lane-dense store).
    logits_ref[...] = logits.astype(logits_ref.dtype)

    @pl.when(j == pl.num_programs(1) - 1)
    def _finalize():
        lse_ref[...] = m_ref[...] + jnp.log(s_ref[...])


def _fixup_kernel(logits_ref, lse_ref, o_ref):
    # out = logits - lse, f32 subtraction, cast to output dtype.
    o_ref[...] = (
        logits_ref[...].astype(jnp.float32) - lse_ref[...]
    ).astype(o_ref.dtype)


@functools.partial(
    jax.jit, static_argnames=("tm", "tn", "compute_dtype", "logits_dtype"))
def generator_forward(x, w, b, *, tm=None, tn=None,
                      compute_dtype=jnp.bfloat16, logits_dtype=jnp.float32):
    """log_softmax(x @ w + b, axis=-1).

    x: [batch, seq, d_model]; w: [d_model, vocab] (transposed vs. torch Linear);
    b: [vocab].  Returns [batch, seq, vocab] in x.dtype.
    """
    batch, seq, d_model = x.shape
    vocab = w.shape[1]
    rows = batch * seq
    out_dtype = x.dtype

    cdt_size = jnp.dtype(compute_dtype).itemsize
    inter_size = jnp.dtype(logits_dtype).itemsize
    out_size = jnp.dtype(out_dtype).itemsize

    d_model_p = _round_up(d_model, 128)
    vmem_budget = _vmem_budget_bytes()

    # ---- tile sizing (budget-driven, per generation) ----
    if tn is None:
        tn = 1024 if d_model_p <= 2048 else 512
    tn = _round_up(min(tn, _round_up(vocab, 128)), 128)
    if tm is None:
        tm = _tm_target()
    tm = _round_up(min(tm, _round_up(rows, 16)), 16)

    def pass1_bytes(tm_, tn_):
        return (2 * (tm_ * d_model_p * cdt_size      # x tile (double-buffered)
                     + d_model_p * tn_ * cdt_size    # W tile (double-buffered)
                     + tn_ * 4                       # bias tile
                     + tm_ * tn_ * inter_size        # streamed logits out tile
                     + tm_ * 128 * 4)                # lse out tile (lane-padded)
                + 2 * tm_ * 4)                       # m/s scratch

    while pass1_bytes(tm, tn) > vmem_budget and tm > 16:
        tm = max(16, _round_up(tm // 2, 16))
    while pass1_bytes(tm, tn) > vmem_budget and tn > 128:
        tn = max(128, _round_up(tn // 2, 128))

    vocab_p = _round_up(vocab, tn)
    rows_p = _round_up(rows, tm)
    nj = vocab_p // tn
    ni = rows_p // tm

    # ---- input padding / casting (skipped when already aligned) ----
    x2d = x.reshape(rows, d_model)
    if (rows_p, d_model_p) != (rows, d_model):
        x2d = jnp.pad(x2d, ((0, rows_p - rows), (0, d_model_p - d_model)))
    if x2d.dtype != compute_dtype:
        x2d = x2d.astype(compute_dtype)

    w_p = w
    if (d_model_p, vocab_p) != (d_model, vocab):
        w_p = jnp.pad(w_p, ((0, d_model_p - d_model), (0, vocab_p - vocab)))
    if w_p.dtype != compute_dtype:
        w_p = w_p.astype(compute_dtype)

    # Padded vocab columns get a hugely negative bias so exp() underflows to 0
    # and they never perturb the log-softmax of the real columns.
    b_p = b.astype(jnp.float32)
    if vocab_p != vocab:
        b_p = jnp.pad(b_p, (0, vocab_p - vocab), constant_values=-1e30)
    b_p = b_p.reshape(1, vocab_p)

    # ---- pass 1: logits (streamed) + per-row LSE ----
    pass1_limit = int(min(max(pass1_bytes(tm, tn) + (4 << 20), 24 << 20),
                          vmem_budget))
    cost1 = pl.CostEstimate(
        flops=2 * rows_p * d_model_p * vocab_p,
        transcendentals=rows_p * vocab_p,
        bytes_accessed=(rows_p * d_model_p * cdt_size
                        + ni * d_model_p * vocab_p * cdt_size
                        + vocab_p * 4
                        + rows_p * vocab_p * inter_size
                        + rows_p * 4),
    )

    logits, lse = pl.pallas_call(
        _logits_lse_kernel,
        out_shape=(jax.ShapeDtypeStruct((rows_p, vocab_p), logits_dtype),
                   jax.ShapeDtypeStruct((rows_p, 1), jnp.float32)),
        grid_spec=pltpu.PrefetchScalarGridSpec(
            num_scalar_prefetch=0,
            grid=(ni, nj),
            in_specs=[
                pl.BlockSpec((tm, d_model_p), lambda i, j: (i, 0)),
                pl.BlockSpec((d_model_p, tn), lambda i, j: (0, j)),
                pl.BlockSpec((1, tn), lambda i, j: (0, j)),
            ],
            out_specs=[
                pl.BlockSpec((tm, tn), lambda i, j: (i, j)),   # streamed logits
                pl.BlockSpec((tm, 1), lambda i, j: (i, 0)),    # resident per-row LSE
            ],
            scratch_shapes=[
                pltpu.VMEM((tm, 1), jnp.float32),   # running max
                pltpu.VMEM((tm, 1), jnp.float32),   # running sum
            ],
        ),
        compiler_params=pltpu.CompilerParams(
            dimension_semantics=("parallel", "arbitrary"),
            vmem_limit_bytes=pass1_limit,
        ),
        cost_estimate=cost1,
    )(x2d, w_p, b_p)

    # ---- pass 2: elementwise fix-up out = logits - lse (mem-bound, big tiles) ----
    def pass2_bytes(tn2_):
        return 2 * (tm * tn2_ * (inter_size + out_size) + tm * 128 * 4)

    tn2 = tn
    while (tn2 * 2 <= vocab_p and vocab_p % (tn2 * 2) == 0
           and pass2_bytes(tn2 * 2) <= vmem_budget):
        tn2 *= 2
    nj2 = vocab_p // tn2
    pass2_limit = int(min(max(pass2_bytes(tn2) + (2 << 20), 16 << 20),
                          vmem_budget))

    out2d = pl.pallas_call(
        _fixup_kernel,
        out_shape=jax.ShapeDtypeStruct((rows_p, vocab_p), out_dtype),
        grid_spec=pltpu.PrefetchScalarGridSpec(
            num_scalar_prefetch=0,
            grid=(ni, nj2),
            in_specs=[
                pl.BlockSpec((tm, tn2), lambda i, j: (i, j)),
                pl.BlockSpec((tm, 1), lambda i, j: (i, 0)),
            ],
            out_specs=pl.BlockSpec((tm, tn2), lambda i, j: (i, j)),
        ),
        compiler_params=pltpu.CompilerParams(
            dimension_semantics=("parallel", "parallel"),
            vmem_limit_bytes=pass2_limit,
        ),
    )(logits, lse)

    if (rows_p, vocab_p) != (rows, vocab):
        out2d = out2d[:rows, :vocab]
    return out2d.reshape(batch, seq, vocab)


if __name__ == "__main__":
    # Small, deterministic synthetic setup consistent with Generator(d_model, vocab).
    batch, seq, d_model, vocab = 2, 8, 32, 64

    key = jax.random.PRNGKey(0)
    kx, kw, kb = jax.random.split(key, 3)

    # nn.Linear default init: U(-1/sqrt(d_model), 1/sqrt(d_model))
    bound = 1.0 / (d_model ** 0.5)
    w = jax.random.uniform(kw, (d_model, vocab), jnp.float32, -bound, bound)
    b = jax.random.uniform(kb, (vocab,), jnp.float32, -bound, bound)
    x = jax.random.normal(kx, (batch, seq, d_model), jnp.float32)

    out = jax.block_until_ready(generator_forward(x, w, b))
    assert out.shape == (batch, seq, vocab)
    assert not bool(jnp.any(jnp.isnan(out)))

    # Reference with the same bf16 matmul inputs / f32 accumulation & softmax.
    logits_ref = jnp.einsum(
        "bsd,dv->bsv", x.astype(jnp.bfloat16), w.astype(jnp.bfloat16),
        preferred_element_type=jnp.float32) + b
    ref = jax.nn.log_softmax(logits_ref, axis=-1)
    assert jnp.allclose(out, ref, atol=2e-3, rtol=2e-3), \
        float(jnp.max(jnp.abs(out - ref)))

    # Loose check against full-f32 math (difference is bf16 rounding of matmul inputs).
    ref_f32 = jax.nn.log_softmax(jnp.einsum("bsd,dv->bsv", x, w) + b, axis=-1)
    assert jnp.allclose(out, ref_f32, atol=5e-2, rtol=5e-2)

    print("KERNEL_OK")
</pallas_src>

<mosaic_0001>
module attributes {stable_mosaic.version = 11 : i64} {
  func.func @_fixup_kernel(%arg0: i32, %arg1: i32, %arg2: memref<16x128xf32, #tpu.memory_space<vmem>>, %arg3: memref<16x1xf32, #tpu.memory_space<vmem>>, %arg4: memref<16x128xf32, #tpu.memory_space<vmem>>) attributes {dimension_semantics = [#tpu.dimension_semantics<parallel>, #tpu.dimension_semantics<parallel>], iteration_bounds = array<i64: 1, 1>, scalar_prefetch = 0 : i64, scratch_operands = 0 : i64, tpu.core_type = #tpu.core_type<tc>, window_params = [{transform_indices = @transform_0, window_bounds = array<i64: 16, 128>}, {transform_indices = @transform_1, window_bounds = array<i64: 16, 1>}, {transform_indices = @transform_2, window_bounds = array<i64: 16, 128>}]} {
    %c0 = arith.constant 0 : index
    %c0_0 = arith.constant 0 : index
    %0 = vector.load %arg2[%c0, %c0_0] : memref<16x128xf32, #tpu.memory_space<vmem>>, vector<16x128xf32>
    %c0_1 = arith.constant 0 : index
    %c0_2 = arith.constant 0 : index
    %1 = vector.load %arg3[%c0_1, %c0_2] : memref<16x1xf32, #tpu.memory_space<vmem>>, vector<16x1xf32>
    %2 = vector.broadcast %1 : vector<16x1xf32> to vector<16x128xf32>
    %3 = arith.subf %0, %2 : vector<16x128xf32>
    %c0_3 = arith.constant 0 : index
    %c0_4 = arith.constant 0 : index
    %4 = vector.load %arg4[%c0_3, %c0_4] : memref<16x128xf32, #tpu.memory_space<vmem>>, vector<16x128xf32>
    tpu.vector_store %arg4[%c0_3, %c0_4], %3 {strides = array<i32>} : memref<16x128xf32, #tpu.memory_space<vmem>>, vector<16x128xf32>,
    return
  }
  func.func @transform_0(%arg0: i32, %arg1: i32) -> (i32, i32) {
    %c0_i32 = arith.constant 0 : i32
    return %arg0, %arg1 : i32, i32
  }
  func.func @transform_1(%arg0: i32, %arg1: i32) -> (i32, i32) {
    %c0_i32 = arith.constant 0 : i32
    %c0_i32_0 = arith.constant 0 : i32
    return %arg0, %c0_i32 : i32, i32
  }
  func.func @transform_2(%arg0: i32, %arg1: i32) -> (i32, i32) {
    %c0_i32 = arith.constant 0 : i32
    return %arg0, %arg1 : i32, i32
  }
}

module attributes {stable_mosaic.version = 11 : i64} {
  func.func @_logits_lse_kernel(%arg0: i32, %arg1: i32, %arg2: memref<16x128xbf16, #tpu.memory_space<vmem>>, %arg3: memref<128x128xbf16, #tpu.memory_space<vmem>>, %arg4: memref<1x128xf32, #tpu.memory_space<vmem>>, %arg5: memref<16x128xf32, #tpu.memory_space<vmem>>, %arg6: memref<16x1xf32, #tpu.memory_space<vmem>>, %arg7: memref<16x1xf32, #tpu.memory_space<vmem>>, %arg8: memref<16x1xf32, #tpu.memory_space<vmem>>) attributes {dimension_semantics = [#tpu.dimension_semantics<parallel>, #tpu.dimension_semantics<arbitrary>], iteration_bounds = array<i64: 1, 1>, scalar_prefetch = 0 : i64, scratch_operands = 2 : i64, tpu.core_type = #tpu.core_type<tc>, window_params = [{transform_indices = @transform_0, window_bounds = array<i64: 16, 128>}, {transform_indices = @transform_1, window_bounds = array<i64: 128, 128>}, {transform_indices = @transform_2, window_bounds = array<i64: 1, 128>}, {transform_indices = @transform_3, window_bounds = array<i64: 16, 128>}, {transform_indices = @transform_4, window_bounds = array<i64: 16, 1>}]} {
    %c0_i32 = arith.constant 0 : i32
    %0 = arith.cmpi eq, %arg1, %c0_i32 : i32
    %1 = arith.extui %0 : i1 to i32
    %c0_i32_0 = arith.constant 0 : i32
    %2 = arith.cmpi ne, %1, %c0_i32_0 : i32
    scf.if %2 {
      %cst_20 = arith.constant 0xFF800000 : f32
      %29 = vector.broadcast %cst_20 : f32 to vector<16x1xf32>
      %c0_21 = arith.constant 0 : index
      %c0_22 = arith.constant 0 : index
      %30 = vector.load %arg7[%c0_21, %c0_22] : memref<16x1xf32, #tpu.memory_space<vmem>>, vector<16x1xf32>
      tpu.vector_store %arg7[%c0_21, %c0_22], %29 {strides = array<i32>} : memref<16x1xf32, #tpu.memory_space<vmem>>, vector<16x1xf32>,
      %cst_23 = arith.constant 0.000000e+00 : f32
      %31 = vector.broadcast %cst_23 : f32 to vector<16x1xf32>
      %c0_24 = arith.constant 0 : index
      %c0_25 = arith.constant 0 : index
      %32 = vector.load %arg8[%c0_24, %c0_25] : memref<16x1xf32, #tpu.memory_space<vmem>>, vector<16x1xf32>
      tpu.vector_store %arg8[%c0_24, %c0_25], %31 {strides = array<i32>} : memref<16x1xf32, #tpu.memory_space<vmem>>, vector<16x1xf32>,
    } else {
    }
    %c0 = arith.constant 0 : index
    %c0_1 = arith.constant 0 : index
    %3 = vector.load %arg2[%c0, %c0_1] : memref<16x128xbf16, #tpu.memory_space<vmem>>, vector<16x128xbf16>
    %c0_2 = arith.constant 0 : index
    %c0_3 = arith.constant 0 : index
    %4 = vector.load %arg3[%c0_2, %c0_3] : memref<128x128xbf16, #tpu.memory_space<vmem>>, vector<128x128xbf16>
    %cst = arith.constant dense<0.000000e+00> : vector<16x128xf32>
    %5 = tpu.matmul %3, %4, %cst {dimension_numbers = #tpu.dot_dimension_numbers<[1], [0], [0], [1], [0, 0, 1, 1], [], []>} : vector<16x128xbf16>, vector<128x128xbf16>, vector<16x128xf32> -> vector<16x128xf32>
    %c0_4 = arith.constant 0 : index
    %c0_5 = arith.constant 0 : index
    %6 = vector.load %arg4[%c0_4, %c0_5] : memref<1x128xf32, #tpu.memory_space<vmem>>, vector<1x128xf32>
    %7 = vector.broadcast %6 : vector<1x128xf32> to vector<16x128xf32>
    %8 = arith.addf %5, %7 : vector<16x128xf32>
    %c0_6 = arith.constant 0 : index
    %c0_7 = arith.constant 0 : index
    %9 = vector.load %arg7[%c0_6, %c0_7] : memref<16x1xf32, #tpu.memory_space<vmem>>, vector<16x1xf32>
    %cst_8 = arith.constant dense<0xFF800000> : vector<16xf32>
    %10 = vector.multi_reduction <maximumf>, %8, %cst_8 [1] : vector<16x128xf32> to vector<16xf32>
    %11 = vector.shape_cast %10 : vector<16xf32> to vector<16x1xf32>
    %12 = arith.maximumf %9, %11 : vector<16x1xf32>
    %13 = arith.subf %9, %12 : vector<16x1xf32>
    %14 = math.exp %13 : vector<16x1xf32>
    %c0_9 = arith.constant 0 : index
    %c0_10 = arith.constant 0 : index
    %15 = vector.load %arg8[%c0_9, %c0_10] : memref<16x1xf32, #tpu.memory_space<vmem>>, vector<16x1xf32>
    %16 = arith.mulf %14, %15 : vector<16x1xf32>
    %17 = vector.broadcast %12 : vector<16x1xf32> to vector<16x128xf32>
    %18 = arith.subf %8, %17 : vector<16x128xf32>
    %19 = math.exp %18 : vector<16x128xf32>
    %cst_11 = arith.constant dense<0.000000e+00> : vector<16xf32>
    %20 = vector.multi_reduction <add>, %19, %cst_11 [1] : vector<16x128xf32> to vector<16xf32>
    %21 = vector.shape_cast %20 : vector<16xf32> to vector<16x1xf32>
    %22 = arith.addf %16, %21 : vector<16x1xf32>
    %c0_12 = arith.constant 0 : index
    %c0_13 = arith.constant 0 : index
    %23 = vector.load %arg8[%c0_12, %c0_13] : memref<16x1xf32, #tpu.memory_space<vmem>>, vector<16x1xf32>
    tpu.vector_store %arg8[%c0_12, %c0_13], %22 {strides = array<i32>} : memref<16x1xf32, #tpu.memory_space<vmem>>, vector<16x1xf32>,
    %c0_14 = arith.constant 0 : index
    %c0_15 = arith.constant 0 : index
    %24 = vector.load %arg7[%c0_14, %c0_15] : memref<16x1xf32, #tpu.memory_space<vmem>>, vector<16x1xf32>
    tpu.vector_store %arg7[%c0_14, %c0_15], %12 {strides = array<i32>} : memref<16x1xf32, #tpu.memory_space<vmem>>, vector<16x1xf32>,
    %c0_16 = arith.constant 0 : index
    %c0_17 = arith.constant 0 : index
    %25 = vector.load %arg5[%c0_16, %c0_17] : memref<16x128xf32, #tpu.memory_space<vmem>>, vector<16x128xf32>
    tpu.vector_store %arg5[%c0_16, %c0_17], %8 {strides = array<i32>} : memref<16x128xf32, #tpu.memory_space<vmem>>, vector<16x128xf32>,
    %c0_i32_18 = arith.constant 0 : i32
    %26 = arith.cmpi eq, %arg1, %c0_i32_18 : i32
    %27 = arith.extui %26 : i1 to i32
    %c0_i32_19 = arith.constant 0 : i32
    %28 = arith.cmpi ne, %27, %c0_i32_19 : i32
    scf.if %28 {
      %c0_20 = arith.constant 0 : index
      %c0_21 = arith.constant 0 : index
      %29 = vector.load %arg7[%c0_20, %c0_21] : memref<16x1xf32, #tpu.memory_space<vmem>>, vector<16x1xf32>
      %c0_22 = arith.constant 0 : index
      %c0_23 = arith.constant 0 : index
      %30 = vector.load %arg8[%c0_22, %c0_23] : memref<16x1xf32, #tpu.memory_space<vmem>>, vector<16x1xf32>
      %31 = math.log %30 : vector<16x1xf32>
      %32 = arith.addf %29, %31 : vector<16x1xf32>
      %c0_24 = arith.constant 0 : index
      %c0_25 = arith.constant 0 : index
      %33 = vector.load %arg6[%c0_24, %c0_25] : memref<16x1xf32, #tpu.memory_space<vmem>>, vector<16x1xf32>
      tpu.vector_store %arg6[%c0_24, %c0_25], %32 {strides = array<i32>} : memref<16x1xf32, #tpu.memory_space<vmem>>, vector<16x1xf32>,
    } else {
    }
    return
  }
  func.func @transform_0(%arg0: i32, %arg1: i32) -> (i32, i32) {
    %c0_i32 = arith.constant 0 : i32
    %c0_i32_0 = arith.constant 0 : i32
    return %arg0, %c0_i32 : i32, i32
  }
  func.func @transform_1(%arg0: i32, %arg1: i32) -> (i32, i32) {
    %c0_i32 = arith.constant 0 : i32
    %c0_i32_0 = arith.constant 0 : i32
    return %c0_i32, %arg1 : i32, i32
  }
  func.func @transform_2(%arg0: i32, %arg1: i32) -> (i32, i32) {
    %c0_i32 = arith.constant 0 : i32
    %c0_i32_0 = arith.constant 0 : i32
    return %c0_i32, %arg1 : i32, i32
  }
  func.func @transform_3(%arg0: i32, %arg1: i32) -> (i32, i32) {
    %c0_i32 = arith.constant 0 : i32
    return %arg0, %arg1 : i32, i32
  }
  func.func @transform_4(%arg0: i32, %arg1: i32) -> (i32, i32) {
    %c0_i32 = arith.constant 0 : i32
    %c0_i32_0 = arith.constant 0 : i32
    return %arg0, %c0_i32 : i32, i32
  }
}

</mosaic_0001>

<bundles_post_ra>
// kernel: generator_forward.3
= control target key start
LH: loop header
LB: loop body
LE: loop exit
PB: predicated region body
PF: predicated region fallthrough
CT: control target
= control target key end

     0   :  { %v35_v0 = vmov 0   ;;  %s69_s1 = inlined_call_operand.vmem [shape: f32[16,1], index: 1, kind: input, shape index: {}]   ;;  %s70_s0 = inlined_call_operand.vmem [shape: f32[16,128], index: 0, kind: input, shape index: {}]   ;;  %s71_s2 = inlined_call_operand.vmem [shape: f32[16,128], index: 2, kind: output, shape index: {}]  }
   0x1   :  { %34 = vset.pattern.permute.xlu0 %v35_v0  ;;  %v13_v1 = vld [vmem:[%s69_s1] sm:$0xff]  ;;  %v14_v2 = vld [vmem:[%s69_s1 + $0x8] sm:$0xff] }
   0x2   :  { %17 = vperm.xlu0 %34, %v13_v1   ;;  %v11_v3 = vld [vmem:[%s70_s0] sm:$0xff]  ;;  %v12_v6 = vld [vmem:[%s70_s0 + $0x8] sm:$0xff] }
   0x6   :  { %22 = vperm.xlu0 %34, %v14_v2  }
  0x81   :  { %v18_v4 = vpop.permute.xlu0 %17 }
  0x82   :  { %v25_v5 = vsub.f32 %v11_v3, %v18_v4 }
  0x84   :  { %27 = vst [vmem:[%s71_s2] sm:$0xff] %v25_v5 }
  0x85   :  { %v23_v7 = vpop.permute.xlu0 %22 }
  0x86   :  { %v26_v8 = vsub.f32 %v12_v6, %v23_v7 }
  0x88   :  { %28 = vst [vmem:[%s71_s2 + $0x8] sm:$0xff] %v26_v8 }

// kernel: generator_forward.2
= control target key start
LH: loop header
LB: loop body
LE: loop exit
PB: predicated region body
PF: predicated region fallthrough
CT: control target
= control target key end

     0   :  { %v282_v0 = vmov 0.0   ;;  %vm283_vm0 = vmmov 0   ;;  %vm21_vm1 = vcmask 7168   ;;  %v284_v10 = vmov -inf   ;;  %s363_s1 = inlined_call_operand.vmem [shape: bf16[128,128], index: 1, kind: input, shape index: {}]   ;;  %s364_s0 = inlined_call_operand.vmem [shape: bf16[16,128], index: 0, kind: input, shape index: {}]   ;;  %s365_s2 = inlined_call_operand.vmem [shape: f32[1,128], index: 2, kind: input, shape index: {}]   ;;  %s366_s3 = inlined_call_operand.vmem [shape: f32[16,128], index: 3, kind: output, shape index: {0}]   ;;  %s367_s4 = inlined_call_operand.vmem [shape: f32[16,1], index: 4, kind: output, shape index: {1}]  }
   0x1   :  { %235 = vmatprep.subr.bf16.mxu0 %v282_v0  ;;  %v261_v1 = vld [vmem:[%s363_s1] sm:$0xff]   ;;  %251 = vmatprep.mubr.msk.bf16.mxu0 %vm283_vm0, %v282_v0  ;;  %v262_v2 = vld [vmem:[%s363_s1 + $0x8] sm:$0xff]   ;;  %v263_v3 = vld [vmem:[%s363_s1 + $0x10] sm:$0xff]   ;;  %22 = vst.msk [vmem:[#allocation2] sm:$0xff] %vm21_vm1, %v284_v10  ;;  %v285_v18 = vmov 0  }
   0x2   :  { %236 = vmatpush3.bf16.msra.mxu0 %v261_v1  ;;  %v264_v4 = vld [vmem:[%s363_s1 + $0x18] sm:$0xff]   ;;  %v265_v5 = vld [vmem:[%s363_s1 + $0x20] sm:$0xff]   ;;  %v266_v6 = vld [vmem:[%s363_s1 + $0x28] sm:$0xff]   ;;  %23 = vst.msk [vmem:[#allocation2 + $0x8] sm:$0xff] %vm21_vm1, %v284_v10  ;;  %259 = vset.pattern.permute.xlu1 %v285_v18 }
   0x3   :  { %237 = vmatprep.subr.bf16.mxu0 %v282_v0  ;;  %v267_v7 = vld [vmem:[%s363_s1 + $0x30] sm:$0xff]   ;;  %v268_v8 = vld [vmem:[%s363_s1 + $0x38] sm:$0xff]   ;;  %v269_v9 = vld [vmem:[%s364_s0] sm:$0xff]   ;;  %24 = vst.msk [vmem:[#allocation3] sm:$0xff] %vm21_vm1, %v282_v0  ;;  %260 = vset.pattern.permute.xlu0 %v285_v18 }
   0x4   :  { %25 = vst.msk [vmem:[#allocation3 + $0x8] sm:$0xff] %vm21_vm1, %v282_v0  ;;  %v216_v11 = vld [vmem:[%s365_s2] ss:$0 sm:$0xff] }
   0x6   :  { %238 = vmatpush3.bf16.msra.mxu0 %v262_v2 }
   0x7   :  { %239 = vmatprep.subr.bf16.mxu0 %v282_v0 }
   0x8   :  { %v146_v19 = vld [vmem:[#allocation2] sm:$0xff] }
   0x9   :  { %v147_v22 = vld [vmem:[#allocation2 + $0x8] sm:$0xff] }
   0xa   :  { %240 = vmatpush3.bf16.msra.mxu0 %v263_v3  ;;  %v160_v38 = vld [vmem:[#allocation3] sm:$0xff] }
   0xb   :  { %241 = vmatprep.subr.bf16.mxu0 %v282_v0  ;;  %v161_v42 = vld [vmem:[#allocation3 + $0x8] sm:$0xff] }
   0xe   :  { %242 = vmatpush3.bf16.msra.mxu0 %v264_v4 }
   0xf   :  { %243 = vmatprep.subr.bf16.mxu0 %v282_v0 }
  0x12   :  { %244 = vmatpush3.bf16.msra.mxu0 %v265_v5 }
  0x13   :  { %245 = vmatprep.subr.bf16.mxu0 %v282_v0 }
  0x16   :  { %246 = vmatpush3.bf16.msra.mxu0 %v266_v6 }
  0x17   :  { %247 = vmatprep.subr.bf16.mxu0 %v282_v0 }
  0x1a   :  { %248 = vmatpush3.bf16.msra.mxu0 %v267_v7 }
  0x1b   :  { %249 = vmatprep.subr.bf16.mxu0 %v282_v0 }
  0x1e   :  { %250 = vmatpush3.bf16.msra.mxu0 %v268_v8 }
  0x21   :  { %252 = vmatmul.mubr.bf16.vlgmr.msra.gmra.mrb[0].mxu0 %v269_v9 }
  0xf4   :  { %v139_v12 = vpop.f32.mrb[0].mxu0 }
  0xf5   :  { %v140_v13 = vadd.f32 %v216_v11, %v139_v12  ;;  %v253_v14 = vpop.f32.mrb[1].mxu0 }
  0xf6   :  { %v142_v15 = vpop.f32.mrb[2].mxu0 }
  0xf7   :  { %191 = vst [vmem:[%s366_s3] sm:$0xff] %v140_v13  ;;  %v143_v16 = vadd.f32 %v216_v11, %v142_v15  ;;  %148 = vmax.xlane.f32.xlu0 %v140_v13  ;;  %v254_v17 = vpop.f32.mrb[3].mxu0 }
  0xf9   :  { %192 = vst [vmem:[%s366_s3 + $0x8] sm:$0xff] %v143_v16 }
  0xfb   :  { %150 = vmax.xlane.f32.xlu0 %v143_v16 }
 0x184   :  { %v149_v20 = vpop.xlane.xlu0 %148 }
 0x185   :  { %v152_v21 = vmax.f32 %v146_v19, %v149_v20 }
 0x187   :  { %v154_v23 = vsub.f32 %v146_v19, %v152_v21  ;;  %189 = vst.msk [vmem:[#allocation2] sm:$0xff] %vm21_vm1, %v152_v21  ;;  %166 = vperm.xlu1 %259, %v152_v21  }
 0x188   :  { %v151_v24 = vpop.xlane.xlu0 %150 }
 0x189   :  { %v153_v25 = vmax.f32 %v147_v22, %v151_v24  ;;  %v156_v35 = vmul.f32 1.442695, %v154_v23 }
 0x18b   :  { %v155_v26 = vsub.f32 %v147_v22, %v153_v25  ;;  %190 = vst.msk [vmem:[#allocation2 + $0x8] sm:$0xff] %vm21_vm1, %v153_v25  ;;  %171 = vperm.xlu1 %259, %v153_v25  }
 0x18d   :  { %v158_v36 = vmul.f32 1.442695, %v155_v26 }
 0x18e   :  { %v196_v51 = vld [vmem:[#allocation2] sm:$0xff] }
 0x192   :  { %v197_v55 = vld [vmem:[#allocation2 + $0x8] sm:$0xff] }
 0x206   :  { %v167_v27 = vpop.permute.xlu1 %166 }
 0x207   :  { %v174_v28 = vsub.f32 %v140_v13, %v167_v27 }
 0x209   :  { %v176_v29 = vmul.f32 1.442695, %v174_v28 }
 0x20a   :  { %v172_v30 = vpop.permute.xlu1 %171 }
 0x20b   :  { %270 = vpow2.f32 %v176_v29  ;;  %v175_v31 = vsub.f32 %v143_v16, %v172_v30 }
 0x20d   :  { %v178_v32 = vmul.f32 1.442695, %v175_v31 }
 0x20f   :  { %272 = vpow2.f32 %v178_v32 }
 0x210   :  { %274 = vpow2.f32 %v156_v35 }
 0x211   :  { %276 = vpow2.f32 %v158_v36 }
 0x215   :  { %v271_v33 = vpop.eup %270 }
 0x216   :  { %180 = vadd.xlane.f32.xlu0 %v271_v33 }
 0x219   :  { %v273_v34 = vpop.eup %272 }
 0x21a   :  { %182 = vadd.xlane.f32.xlu1 %v273_v34  ;;  %v275_v37 = vpop.eup %274 }
 0x21b   :  { %v162_v39 = vmul.f32 %v275_v37, %v160_v38  ;;  %v277_v40 = vpop.eup %276 }
 0x21c   :  { %v163_v44 = vmul.f32 %v277_v40, %v161_v42 }
 0x2a3   :  { %v181_v41 = vpop.xlane.xlu0 %180 }
 0x2a4   :  { %v184_v43 = vadd.f32 %v181_v41, %v162_v39 }
 0x2a6   :  { %187 = vst.msk [vmem:[#allocation3] sm:$0xff] %vm21_vm1, %v184_v43 }
 0x2a7   :  { %v183_v45 = vpop.xlane.xlu1 %182 }
 0x2a8   :  { %v185_v46 = vadd.f32 %v183_v45, %v163_v44 }
 0x2aa   :  { %188 = vst.msk [vmem:[#allocation3 + $0x8] sm:$0xff] %vm21_vm1, %v185_v46 }
 0x2ad   :  { %v198_v47 = vld [vmem:[#allocation3] sm:$0xff] }
 0x2ae   :  { %278 = vlog2.f32 %v198_v47 }
 0x2b1   :  { %v199_v48 = vld [vmem:[#allocation3 + $0x8] sm:$0xff] }
 0x2b2   :  { %280 = vlog2.f32 %v199_v48 }
 0x2b8   :  { %v279_v49 = vpop.eup %278 }
 0x2b9   :  { %v201_v50 = vmul.f32 0.6931472, %v279_v49 }
 0x2bb   :  { %v204_v52 = vadd.f32 %v201_v50, %v196_v51 }
 0x2bc   :  { %v281_v53 = vpop.eup %280 }
 0x2bd   :  { %206 = vst.msk [vmem:[%s367_s4] sm:$0xff] %vm21_vm1, %v204_v52  ;;  %v203_v54 = vmul.f32 0.6931472, %v281_v53 }
 0x2bf   :  { %v205_v56 = vadd.f32 %v203_v54, %v197_v55 }
 0x2c1   :  { %207 = vst.msk [vmem:[%s367_s4 + $0x8] sm:$0xff] %vm21_vm1, %v205_v56 }

</bundles_post_ra>
